<compile_context>
chip_gen: v7x
topology: tpu7x:2x2x1
jax: 0.10.0
libtpu: 0.0.40
codegen_flags: <defaults>
</compile_context>

<pallas_src>
import functools

import jax
import jax.numpy as jnp
from jax.experimental import pallas as pl
from jax.experimental.pallas import tpu as pltpu


def _round_up(n, m):
    return ((n + m - 1) // m) * m


def _pad2(a, rows, cols):
    pr, pc = rows - a.shape[0], cols - a.shape[1]
    if pr == 0 and pc == 0:
        return a
    return jnp.pad(a, ((0, pr), (0, pc)))


def _tpu_vmem_bytes():
    try:
        return int(pltpu.get_tpu_info().vmem_capacity_bytes)
    except Exception:
        return 64 << 20  # conservative: v7x per-TensorCore VMEM


def _is_v5e():
    try:
        return "v5" in jax.devices()[0].device_kind.lower()
    except Exception:
        return False


def _student_mlp_kernel(x_ref, w1_ref, b1_ref, w2_ref, b2_ref, w3_ref, b3_ref,
                        out_ref, *, num_subtiles):
    """relu(x@W1+b1) -> relu(.@W2+b2) -> .@W3+b3 on one batch tile."""
    w1, w2, w3 = w1_ref[...], w2_ref[...], w3_ref[...]
    b1, b2, b3 = b1_ref[...], b2_ref[...], b3_ref[...]

    def chain(x_f32):
        xb = x_f32.astype(jnp.bfloat16)                        # VPU cast in VMEM
        h = jnp.dot(xb, w1, preferred_element_type=jnp.float32)
        h = jnp.maximum(h + b1, 0.0).astype(jnp.bfloat16)
        h = jnp.dot(h, w2, preferred_element_type=jnp.float32)
        h = jnp.maximum(h + b2, 0.0).astype(jnp.bfloat16)
        h = jnp.dot(h, w3, preferred_element_type=jnp.float32)
        return (h + b3).astype(out_ref.dtype)

    if num_subtiles <= 1:
        out_ref[...] = chain(x_ref[...])
    else:
        # Two independent dependency chains -> scheduler overlaps MXU drains.
        sub = x_ref.shape[0] // num_subtiles
        for t in range(num_subtiles):
            lo, hi = t * sub, (t + 1) * sub
            out_ref[lo:hi, :] = chain(x_ref[lo:hi, :])


@functools.partial(jax.jit, static_argnums=(2, 3))
def _student_forward_impl(x, params, block_b, fancy):
    w1, b1 = params["w1"], params["b1"]
    w2, b2 = params["w2"], params["b2"]
    w3, b3 = params["w3"], params["b3"]

    B, din = x.shape
    hid = w1.shape[1]
    dout = w3.shape[1]

    # ---- generation-aware sizing -------------------------------------------
    vmem_phys = _tpu_vmem_bytes()
    if vmem_phys >= (100 << 20):          # v5e / v6e: 128 MiB VMEM per core
        vmem_ceiling = 100 << 20
        bb_cap = 2048
        min_steps = 1
    else:                                  # v7x: 64 MiB per core, 2 cores/chip
        vmem_ceiling = 56 << 20
        bb_cap = 512
        min_steps = 2                      # give the second TensorCore work

    # v6e/v7x MXUs are 256x256 -> align large feature dims to 256; v5e keeps 128.
    feat_mult = 128 if _is_v5e() else 256
    align = lambda d: _round_up(d, 128) if d <= 128 else _round_up(d, feat_mult)
    din_p, hid_p, dout_p = align(din), align(hid), align(dout)

    # Resident weight/bias footprint (single-buffered when fancy).
    wbuf = 1 if fancy else 2
    weight_bytes = wbuf * (
        (din_p * hid_p + hid_p * hid_p + hid_p * dout_p) * 2     # bf16 weights
        + (2 * hid_p + dout_p) * 4)                              # f32 biases
    # Per-batch-row working set: double-buffered f32 x/out tiles + intermediates.
    per_row = 2 * 4 * din_p + 2 * 4 * dout_p + 16 * hid_p + 2 * din_p + 4 * dout_p

    # TODO(synk): when hid is large enough that W2 alone (hid_p^2 bf16) exceeds
    # the VMEM ceiling, tile the hidden/contraction dims with an extra
    # "arbitrary" grid axis + f32 accumulator instead of keeping W2 resident.
    avail = max(vmem_ceiling - weight_bytes - (2 << 20), 8 * per_row)
    bb_fit = max(8, (avail // per_row) // 8 * 8)
    bb_eff = max(8, min(bb_cap, bb_fit))

    if block_b is None:
        nsteps = max(min_steps, pl.cdiv(B, bb_eff))
        block_b = min(bb_eff, _round_up(pl.cdiv(B, nsteps), 8))
    block_b = max(8, _round_up(int(block_b), 8))
    b_p = _round_up(B, block_b)
    grid = (b_p // block_b,)

    est = weight_bytes + block_b * per_row + (4 << 20)
    vmem_limit = int(min(vmem_ceiling, max(32 << 20, int(est * 1.5))))

    # Single-grid-step latency regime: split the tile into 2 independent chains.
    num_subtiles = 2 if (grid[0] == 1 and block_b >= 16 and block_b % 16 == 0) else 1

    # ---- pad / cast operands -----------------------------------------------
    # x stays f32 (cast to bf16 in-kernel); weights bf16 for the MXU; biases f32.
    x_p = _pad2(x, b_p, din_p)
    w1_p = _pad2(w1.astype(jnp.bfloat16), din_p, hid_p)
    w2_p = _pad2(w2.astype(jnp.bfloat16), hid_p, hid_p)
    w3_p = _pad2(w3.astype(jnp.bfloat16), hid_p, dout_p)
    b1_p = _pad2(b1, 1, hid_p)
    b2_p = _pad2(b2, 1, hid_p)
    b3_p = _pad2(b3, 1, dout_p)

    # Weights/biases: same block every grid step -> VMEM resident; single buffer.
    if fancy:
        resident = lambda a: pl.BlockSpec(a.shape, lambda i: (0, 0),
                                          pipeline_mode=pl.Buffered(1))
    else:
        resident = lambda a: pl.BlockSpec(a.shape, lambda i: (0, 0))

    compiler_params = pltpu.CompilerParams(
        dimension_semantics=("parallel",),
        vmem_limit_bytes=vmem_limit,
        allow_input_fusion=([True, False, False, False, False, False, False]
                            if fancy else None),
    )

    flops = 2 * B * (din * hid + hid * hid + hid * dout)
    bytes_accessed = (x_p.size * 4 + b_p * dout_p * 4
                      + (w1_p.size + w2_p.size + w3_p.size) * 2
                      + (b1_p.size + b2_p.size + b3_p.size) * 4)

    out_p = pl.pallas_call(
        functools.partial(_student_mlp_kernel, num_subtiles=num_subtiles),
        out_shape=jax.ShapeDtypeStruct((b_p, dout_p), jnp.float32),
        grid=grid,
        in_specs=[
            pl.BlockSpec((block_b, din_p), lambda i: (i, 0)),
            resident(w1_p), resident(b1_p),
            resident(w2_p), resident(b2_p),
            resident(w3_p), resident(b3_p),
        ],
        out_specs=pl.BlockSpec((block_b, dout_p), lambda i: (i, 0)),
        compiler_params=compiler_params,
        cost_estimate=pl.CostEstimate(
            flops=flops, transcendentals=0, bytes_accessed=bytes_accessed),
    )(x_p, w1_p, b1_p, w2_p, b2_p, w3_p, b3_p)

    # NOTE: dout is lane-padded to dout_p so the store is unmasked/lane-dense;
    # for tiny dout this trades some write amplification for vst throughput.
    return out_p[:B, :dout]


def student_forward(x, params, *, block_b=None):
    """StudentModel.forward as a fused, batch-tiled Pallas call.

    x: (B, input_dim) float32
    params: dict of w1 (in,H), b1 (1,H), w2 (H,H), b2 (1,H), w3 (H,out), b3 (1,out)
    """
    try:
        return _student_forward_impl(x, params, block_b, True)
    except Exception:
        # Fallback if this JAX build rejects pipeline_mode / allow_input_fusion.
        return _student_forward_impl(x, params, block_b, False)


def init_params(key, input_dim, hidden_dim, output_dim):
    """Deterministic init mimicking nn.Linear's uniform(-1/sqrt(fan_in), ...)."""
    ks = jax.random.split(key, 6)

    def linear(kw, kb, fan_in, fan_out):
        bound = 1.0 / jnp.sqrt(fan_in)
        w = jax.random.uniform(kw, (fan_in, fan_out), jnp.float32, -bound, bound)
        b = jax.random.uniform(kb, (1, fan_out), jnp.float32, -bound, bound)
        return w, b

    w1, b1 = linear(ks[0], ks[1], input_dim, hidden_dim)
    w2, b2 = linear(ks[2], ks[3], hidden_dim, hidden_dim)
    w3, b3 = linear(ks[4], ks[5], hidden_dim, output_dim)
    return {"w1": w1, "b1": b1, "w2": w2, "b2": b2, "w3": w3, "b3": b3}


def _reference_forward(x, p):
    h = jnp.maximum(x @ p["w1"] + p["b1"], 0.0)
    h = jnp.maximum(h @ p["w2"] + p["b2"], 0.0)
    return h @ p["w3"] + p["b3"]


if __name__ == "__main__":
    input_dim, hidden_dim, output_dim = 16, 32, 8
    batch = 8

    key = jax.random.PRNGKey(0)
    kx, kp = jax.random.split(key)

    x = jax.random.normal(kx, (batch, input_dim), dtype=jnp.float32)
    params = init_params(kp, input_dim, hidden_dim, output_dim)

    out = student_forward(x, params)
    out = jax.block_until_ready(out)

    ref = _reference_forward(x, params)
    assert out.shape == (batch, output_dim)
    # bf16 MXU inputs with f32 accumulation -> loosened tolerance vs f32 reference.
    assert jnp.allclose(out, ref, atol=3e-2, rtol=3e-2), (
        float(jnp.max(jnp.abs(out - ref))))

    # TODO(synk): distillation_loss (log_softmax / KL) is a training-time helper,
    # not part of forward(); left to plain JAX if needed.
    print("KERNEL_OK")
</pallas_src>

<mosaic_0001>
module attributes {stable_mosaic.version = 11 : i64} {
  func.func @_student_mlp_kernel(%arg0: i32, %arg1: memref<8x128xf32, #tpu.memory_space<vmem>>, %arg2: memref<128x128xbf16, #tpu.memory_space<vmem>>, %arg3: memref<1x128xf32, #tpu.memory_space<vmem>>, %arg4: memref<128x128xbf16, #tpu.memory_space<vmem>>, %arg5: memref<1x128xf32, #tpu.memory_space<vmem>>, %arg6: memref<128x128xbf16, #tpu.memory_space<vmem>>, %arg7: memref<1x128xf32, #tpu.memory_space<vmem>>, %arg8: memref<8x128xf32, #tpu.memory_space<vmem>>) attributes {dimension_semantics = [#tpu.dimension_semantics<parallel>], iteration_bounds = array<i64: 1>, scalar_prefetch = 0 : i64, scratch_operands = 0 : i64, tpu.core_type = #tpu.core_type<tc>, window_params = [{transform_indices = @transform_0, window_bounds = array<i64: 8, 128>}, {pipeline_mode = #tpu.pipeline_mode<synchronous>, transform_indices = @transform_1, window_bounds = array<i64: 128, 128>}, {pipeline_mode = #tpu.pipeline_mode<synchronous>, transform_indices = @transform_2, window_bounds = array<i64: 1, 128>}, {pipeline_mode = #tpu.pipeline_mode<synchronous>, transform_indices = @transform_3, window_bounds = array<i64: 128, 128>}, {pipeline_mode = #tpu.pipeline_mode<synchronous>, transform_indices = @transform_4, window_bounds = array<i64: 1, 128>}, {pipeline_mode = #tpu.pipeline_mode<synchronous>, transform_indices = @transform_5, window_bounds = array<i64: 128, 128>}, {pipeline_mode = #tpu.pipeline_mode<synchronous>, transform_indices = @transform_6, window_bounds = array<i64: 1, 128>}, {transform_indices = @transform_7, window_bounds = array<i64: 8, 128>}]} {
    %c0 = arith.constant 0 : index
    %c0_0 = arith.constant 0 : index
    %0 = vector.load %arg2[%c0, %c0_0] : memref<128x128xbf16, #tpu.memory_space<vmem>>, vector<128x128xbf16>
    %c0_1 = arith.constant 0 : index
    %c0_2 = arith.constant 0 : index
    %1 = vector.load %arg4[%c0_1, %c0_2] : memref<128x128xbf16, #tpu.memory_space<vmem>>, vector<128x128xbf16>
    %c0_3 = arith.constant 0 : index
    %c0_4 = arith.constant 0 : index
    %2 = vector.load %arg6[%c0_3, %c0_4] : memref<128x128xbf16, #tpu.memory_space<vmem>>, vector<128x128xbf16>
    %c0_5 = arith.constant 0 : index
    %c0_6 = arith.constant 0 : index
    %3 = vector.load %arg3[%c0_5, %c0_6] : memref<1x128xf32, #tpu.memory_space<vmem>>, vector<1x128xf32>
    %c0_7 = arith.constant 0 : index
    %c0_8 = arith.constant 0 : index
    %4 = vector.load %arg5[%c0_7, %c0_8] : memref<1x128xf32, #tpu.memory_space<vmem>>, vector<1x128xf32>
    %c0_9 = arith.constant 0 : index
    %c0_10 = arith.constant 0 : index
    %5 = vector.load %arg7[%c0_9, %c0_10] : memref<1x128xf32, #tpu.memory_space<vmem>>, vector<1x128xf32>
    %c0_11 = arith.constant 0 : index
    %c0_12 = arith.constant 0 : index
    %6 = vector.load %arg1[%c0_11, %c0_12] : memref<8x128xf32, #tpu.memory_space<vmem>>, vector<8x128xf32>
    %7 = arith.truncf %6 : vector<8x128xf32> to vector<8x128xbf16>
    %cst = arith.constant dense<0.000000e+00> : vector<8x128xf32>
    %8 = tpu.matmul %7, %0, %cst {dimension_numbers = #tpu.dot_dimension_numbers<[1], [0], [0], [1], [0, 0, 1, 1], [], []>} : vector<8x128xbf16>, vector<128x128xbf16>, vector<8x128xf32> -> vector<8x128xf32>
    %9 = vector.broadcast %3 : vector<1x128xf32> to vector<8x128xf32>
    %10 = arith.addf %8, %9 : vector<8x128xf32>
    %cst_13 = arith.constant 0.000000e+00 : f32
    %11 = vector.broadcast %cst_13 : f32 to vector<8x128xf32>
    %12 = arith.maximumf %10, %11 : vector<8x128xf32>
    %13 = arith.truncf %12 : vector<8x128xf32> to vector<8x128xbf16>
    %cst_14 = arith.constant dense<0.000000e+00> : vector<8x128xf32>
    %14 = tpu.matmul %13, %1, %cst_14 {dimension_numbers = #tpu.dot_dimension_numbers<[1], [0], [0], [1], [0, 0, 1, 1], [], []>} : vector<8x128xbf16>, vector<128x128xbf16>, vector<8x128xf32> -> vector<8x128xf32>
    %15 = vector.broadcast %4 : vector<1x128xf32> to vector<8x128xf32>
    %16 = arith.addf %14, %15 : vector<8x128xf32>
    %cst_15 = arith.constant 0.000000e+00 : f32
    %17 = vector.broadcast %cst_15 : f32 to vector<8x128xf32>
    %18 = arith.maximumf %16, %17 : vector<8x128xf32>
    %19 = arith.truncf %18 : vector<8x128xf32> to vector<8x128xbf16>
    %cst_16 = arith.constant dense<0.000000e+00> : vector<8x128xf32>
    %20 = tpu.matmul %19, %2, %cst_16 {dimension_numbers = #tpu.dot_dimension_numbers<[1], [0], [0], [1], [0, 0, 1, 1], [], []>} : vector<8x128xbf16>, vector<128x128xbf16>, vector<8x128xf32> -> vector<8x128xf32>
    %21 = vector.broadcast %5 : vector<1x128xf32> to vector<8x128xf32>
    %22 = arith.addf %20, %21 : vector<8x128xf32>
    %c0_17 = arith.constant 0 : index
    %c0_18 = arith.constant 0 : index
    %23 = vector.load %arg8[%c0_17, %c0_18] : memref<8x128xf32, #tpu.memory_space<vmem>>, vector<8x128xf32>
    tpu.vector_store %arg8[%c0_17, %c0_18], %22 {strides = array<i32>} : memref<8x128xf32, #tpu.memory_space<vmem>>, vector<8x128xf32>,
    return
  }
  func.func @transform_0(%arg0: i32) -> (i32, i32) {
    %c0_i32 = arith.constant 0 : i32
    %c0_i32_0 = arith.constant 0 : i32
    return %arg0, %c0_i32 : i32, i32
  }
  func.func @transform_1(%arg0: i32) -> (i32, i32) {
    %c0_i32 = arith.constant 0 : i32
    %c0_i32_0 = arith.constant 0 : i32
    %c0_i32_1 = arith.constant 0 : i32
    return %c0_i32, %c0_i32_0 : i32, i32
  }
  func.func @transform_2(%arg0: i32) -> (i32, i32) {
    %c0_i32 = arith.constant 0 : i32
    %c0_i32_0 = arith.constant 0 : i32
    %c0_i32_1 = arith.constant 0 : i32
    return %c0_i32, %c0_i32_0 : i32, i32
  }
  func.func @transform_3(%arg0: i32) -> (i32, i32) {
    %c0_i32 = arith.constant 0 : i32
    %c0_i32_0 = arith.constant 0 : i32
    %c0_i32_1 = arith.constant 0 : i32
    return %c0_i32, %c0_i32_0 : i32, i32
  }
  func.func @transform_4(%arg0: i32) -> (i32, i32) {
    %c0_i32 = arith.constant 0 : i32
    %c0_i32_0 = arith.constant 0 : i32
    %c0_i32_1 = arith.constant 0 : i32
    return %c0_i32, %c0_i32_0 : i32, i32
  }
  func.func @transform_5(%arg0: i32) -> (i32, i32) {
    %c0_i32 = arith.constant 0 : i32
    %c0_i32_0 = arith.constant 0 : i32
    %c0_i32_1 = arith.constant 0 : i32
    return %c0_i32, %c0_i32_0 : i32, i32
  }
  func.func @transform_6(%arg0: i32) -> (i32, i32) {
    %c0_i32 = arith.constant 0 : i32
    %c0_i32_0 = arith.constant 0 : i32
    %c0_i32_1 = arith.constant 0 : i32
    return %c0_i32, %c0_i32_0 : i32, i32
  }
  func.func @transform_7(%arg0: i32) -> (i32, i32) {
    %c0_i32 = arith.constant 0 : i32
    %c0_i32_0 = arith.constant 0 : i32
    return %arg0, %c0_i32 : i32, i32
  }
}

module attributes {stable_mosaic.version = 11 : i64} {
  func.func @_student_mlp_kernel(%arg0: i32, %arg1: memref<8x128xf32, #tpu.memory_space<vmem>>, %arg2: memref<128x128xbf16, #tpu.memory_space<vmem>>, %arg3: memref<1x128xf32, #tpu.memory_space<vmem>>, %arg4: memref<128x128xbf16, #tpu.memory_space<vmem>>, %arg5: memref<1x128xf32, #tpu.memory_space<vmem>>, %arg6: memref<128x128xbf16, #tpu.memory_space<vmem>>, %arg7: memref<1x128xf32, #tpu.memory_space<vmem>>, %arg8: memref<8x128xf32, #tpu.memory_space<vmem>>) attributes {dimension_semantics = [#tpu.dimension_semantics<parallel>], iteration_bounds = array<i64: 1>, scalar_prefetch = 0 : i64, scratch_operands = 0 : i64, tpu.core_type = #tpu.core_type<tc>, window_params = [{transform_indices = @transform_0, window_bounds = array<i64: 8, 128>}, {pipeline_mode = #tpu.pipeline_mode<synchronous>, transform_indices = @transform_1, window_bounds = array<i64: 128, 128>}, {pipeline_mode = #tpu.pipeline_mode<synchronous>, transform_indices = @transform_2, window_bounds = array<i64: 1, 128>}, {pipeline_mode = #tpu.pipeline_mode<synchronous>, transform_indices = @transform_3, window_bounds = array<i64: 128, 128>}, {pipeline_mode = #tpu.pipeline_mode<synchronous>, transform_indices = @transform_4, window_bounds = array<i64: 1, 128>}, {pipeline_mode = #tpu.pipeline_mode<synchronous>, transform_indices = @transform_5, window_bounds = array<i64: 128, 128>}, {pipeline_mode = #tpu.pipeline_mode<synchronous>, transform_indices = @transform_6, window_bounds = array<i64: 1, 128>}, {transform_indices = @transform_7, window_bounds = array<i64: 8, 128>}]} {
    %c0 = arith.constant 0 : index
    %c0_0 = arith.constant 0 : index
    %0 = vector.load %arg2[%c0, %c0_0] : memref<128x128xbf16, #tpu.memory_space<vmem>>, vector<128x128xbf16>
    %c0_1 = arith.constant 0 : index
    %c0_2 = arith.constant 0 : index
    %1 = vector.load %arg4[%c0_1, %c0_2] : memref<128x128xbf16, #tpu.memory_space<vmem>>, vector<128x128xbf16>
    %c0_3 = arith.constant 0 : index
    %c0_4 = arith.constant 0 : index
    %2 = vector.load %arg6[%c0_3, %c0_4] : memref<128x128xbf16, #tpu.memory_space<vmem>>, vector<128x128xbf16>
    %c0_5 = arith.constant 0 : index
    %c0_6 = arith.constant 0 : index
    %3 = vector.load %arg3[%c0_5, %c0_6] : memref<1x128xf32, #tpu.memory_space<vmem>>, vector<1x128xf32>
    %c0_7 = arith.constant 0 : index
    %c0_8 = arith.constant 0 : index
    %4 = vector.load %arg5[%c0_7, %c0_8] : memref<1x128xf32, #tpu.memory_space<vmem>>, vector<1x128xf32>
    %c0_9 = arith.constant 0 : index
    %c0_10 = arith.constant 0 : index
    %5 = vector.load %arg7[%c0_9, %c0_10] : memref<1x128xf32, #tpu.memory_space<vmem>>, vector<1x128xf32>
    %c0_11 = arith.constant 0 : index
    %c0_12 = arith.constant 0 : index
    %6 = vector.load %arg1[%c0_11, %c0_12] : memref<8x128xf32, #tpu.memory_space<vmem>>, vector<8x128xf32>
    %7 = arith.truncf %6 : vector<8x128xf32> to vector<8x128xbf16>
    %cst = arith.constant dense<0.000000e+00> : vector<8x128xf32>
    %8 = tpu.matmul %7, %0, %cst {dimension_numbers = #tpu.dot_dimension_numbers<[1], [0], [0], [1], [0, 0, 1, 1], [], []>} : vector<8x128xbf16>, vector<128x128xbf16>, vector<8x128xf32> -> vector<8x128xf32>
    %9 = vector.broadcast %3 : vector<1x128xf32> to vector<8x128xf32>
    %10 = arith.addf %8, %9 : vector<8x128xf32>
    %cst_13 = arith.constant 0.000000e+00 : f32
    %11 = vector.broadcast %cst_13 : f32 to vector<8x128xf32>
    %12 = arith.maximumf %10, %11 : vector<8x128xf32>
    %13 = arith.truncf %12 : vector<8x128xf32> to vector<8x128xbf16>
    %cst_14 = arith.constant dense<0.000000e+00> : vector<8x128xf32>
    %14 = tpu.matmul %13, %1, %cst_14 {dimension_numbers = #tpu.dot_dimension_numbers<[1], [0], [0], [1], [0, 0, 1, 1], [], []>} : vector<8x128xbf16>, vector<128x128xbf16>, vector<8x128xf32> -> vector<8x128xf32>
    %15 = vector.broadcast %4 : vector<1x128xf32> to vector<8x128xf32>
    %16 = arith.addf %14, %15 : vector<8x128xf32>
    %cst_15 = arith.constant 0.000000e+00 : f32
    %17 = vector.broadcast %cst_15 : f32 to vector<8x128xf32>
    %18 = arith.maximumf %16, %17 : vector<8x128xf32>
    %19 = arith.truncf %18 : vector<8x128xf32> to vector<8x128xbf16>
    %cst_16 = arith.constant dense<0.000000e+00> : vector<8x128xf32>
    %20 = tpu.matmul %19, %2, %cst_16 {dimension_numbers = #tpu.dot_dimension_numbers<[1], [0], [0], [1], [0, 0, 1, 1], [], []>} : vector<8x128xbf16>, vector<128x128xbf16>, vector<8x128xf32> -> vector<8x128xf32>
    %21 = vector.broadcast %5 : vector<1x128xf32> to vector<8x128xf32>
    %22 = arith.addf %20, %21 : vector<8x128xf32>
    %c0_17 = arith.constant 0 : index
    %c0_18 = arith.constant 0 : index
    %23 = vector.load %arg8[%c0_17, %c0_18] : memref<8x128xf32, #tpu.memory_space<vmem>>, vector<8x128xf32>
    tpu.vector_store %arg8[%c0_17, %c0_18], %22 {strides = array<i32>} : memref<8x128xf32, #tpu.memory_space<vmem>>, vector<8x128xf32>,
    return
  }
  func.func @transform_0(%arg0: i32) -> (i32, i32) {
    %c0_i32 = arith.constant 0 : i32
    %c0_i32_0 = arith.constant 0 : i32
    return %arg0, %c0_i32 : i32, i32
  }
  func.func @transform_1(%arg0: i32) -> (i32, i32) {
    %c0_i32 = arith.constant 0 : i32
    %c0_i32_0 = arith.constant 0 : i32
    %c0_i32_1 = arith.constant 0 : i32
    return %c0_i32, %c0_i32_0 : i32, i32
  }
  func.func @transform_2(%arg0: i32) -> (i32, i32) {
    %c0_i32 = arith.constant 0 : i32
    %c0_i32_0 = arith.constant 0 : i32
    %c0_i32_1 = arith.constant 0 : i32
    return %c0_i32, %c0_i32_0 : i32, i32
  }
  func.func @transform_3(%arg0: i32) -> (i32, i32) {
    %c0_i32 = arith.constant 0 : i32
    %c0_i32_0 = arith.constant 0 : i32
    %c0_i32_1 = arith.constant 0 : i32
    return %c0_i32, %c0_i32_0 : i32, i32
  }
  func.func @transform_4(%arg0: i32) -> (i32, i32) {
    %c0_i32 = arith.constant 0 : i32
    %c0_i32_0 = arith.constant 0 : i32
    %c0_i32_1 = arith.constant 0 : i32
    return %c0_i32, %c0_i32_0 : i32, i32
  }
  func.func @transform_5(%arg0: i32) -> (i32, i32) {
    %c0_i32 = arith.constant 0 : i32
    %c0_i32_0 = arith.constant 0 : i32
    %c0_i32_1 = arith.constant 0 : i32
    return %c0_i32, %c0_i32_0 : i32, i32
  }
  func.func @transform_6(%arg0: i32) -> (i32, i32) {
    %c0_i32 = arith.constant 0 : i32
    %c0_i32_0 = arith.constant 0 : i32
    %c0_i32_1 = arith.constant 0 : i32
    return %c0_i32, %c0_i32_0 : i32, i32
  }
  func.func @transform_7(%arg0: i32) -> (i32, i32) {
    %c0_i32 = arith.constant 0 : i32
    %c0_i32_0 = arith.constant 0 : i32
    return %arg0, %c0_i32 : i32, i32
  }
}

</mosaic_0001>

<bundles_post_ra>
// kernel: _student_forward_impl.2
= control target key start
LH: loop header
LB: loop body
LE: loop exit
PB: predicated region body
PF: predicated region fallthrough
CT: control target
= control target key end

     0   :  { %s734_s0 = inlined_call_operand.vmem [shape: bf16[128,128], index: 0, kind: input, shape index: {}]   ;;  %s735_s1 = inlined_call_operand.vmem [shape: f32[1,128], index: 1, kind: input, shape index: {}]   ;;  %s736_s2 = inlined_call_operand.vmem [shape: bf16[128,128], index: 2, kind: input, shape index: {}]   ;;  %s737_s3 = inlined_call_operand.vmem [shape: f32[1,128], index: 3, kind: input, shape index: {}]   ;;  %s738_s4 = inlined_call_operand.vmem [shape: bf16[128,128], index: 4, kind: input, shape index: {}]   ;;  %s739_s5 = inlined_call_operand.vmem [shape: f32[1,128], index: 5, kind: input, shape index: {}]   ;;  %s740_s6 = inlined_call_operand.vmem [shape: f32[8,16], index: 6, kind: input, shape index: {}]   ;;  %s741_s7 = inlined_call_operand.<no memory space> [shape: f32[], index: 7, kind: input, shape index: {}]   ;;  %s742_s8 = inlined_call_operand.hbm [shape: f32[8,128], index: 8, kind: output, shape index: {}]  }
   0x1   :  { %v13_v0 = vstv %s741_s7 }
   0x2   :  { %v509_v1 = vld [vmem:[%s734_s0] sm:$0xff]   ;;  %v557_v2 = vmov 0.0   ;;  %v510_v3 = vld [vmem:[%s734_s0 + $0x8] sm:$0xff]   ;;  %vm558_vm0 = vmmov 0   ;;  %v511_v4 = vld [vmem:[%s734_s0 + $0x10] sm:$0xff]   ;;  %v30_v7 = vlaneseq }
   0x3   :  { %446 = vmatprep.subr.bf16.mxu0 %v557_v2  ;;  %466 = vmatprep.subr.bf16.mxu1 %v557_v2  ;;  %v517_v5 = vld [vmem:[%s736_s2] sm:$0xff]   ;;  %v512_v6 = vld [vmem:[%s734_s0 + $0x18] sm:$0xff]   ;;  %v518_v8 = vld [vmem:[%s736_s2 + $0x8] sm:$0xff]  }
   0x4   :  { %447 = vmatpush3.bf16.msra.mxu0 %v509_v1  ;;  %462 = vmatprep.mubr.msk.bf16.mxu0 %vm558_vm0, %v557_v2  ;;  %v513_v9 = vld [vmem:[%s734_s0 + $0x20] sm:$0xff]   ;;  %v31_v10 = vand.u32 127, %v30_v7  ;;  %v519_v11 = vld [vmem:[%s736_s2 + $0x10] sm:$0xff]   ;;  %v514_v12 = vld [vmem:[%s734_s0 + $0x28] sm:$0xff]  }
   0x5   :  { %448 = vmatprep.subr.bf16.mxu0 %v557_v2  ;;  %482 = vmatprep.mubr.msk.bf16.mxu1 %vm558_vm0, %v557_v2  ;;  %v520_v13 = vld [vmem:[%s736_s2 + $0x18] sm:$0xff]  }
   0x6   :  { %467 = vmatpush3.bf16.msra.mxu1 %v517_v5 }
   0x7   :  { %468 = vmatprep.subr.bf16.mxu1 %v557_v2 }
   0x8   :  { %449 = vmatpush3.bf16.msra.mxu0 %v510_v3 }
   0x9   :  { %450 = vmatprep.subr.bf16.mxu0 %v557_v2 }
   0xa   :  { %469 = vmatpush3.bf16.msra.mxu1 %v518_v8 }
   0xb   :  { %470 = vmatprep.subr.bf16.mxu1 %v557_v2 }
   0xc   :  { %451 = vmatpush3.bf16.msra.mxu0 %v511_v4 }
   0xd   :  { %452 = vmatprep.subr.bf16.mxu0 %v557_v2 }
   0xe   :  { %471 = vmatpush3.bf16.msra.mxu1 %v519_v11 }
   0xf   :  { %472 = vmatprep.subr.bf16.mxu1 %v557_v2 }
  0x10   :  { %453 = vmatpush3.bf16.msra.mxu0 %v512_v6 }
  0x11   :  { %454 = vmatprep.subr.bf16.mxu0 %v557_v2 }
  0x14   :  { %455 = vmatpush3.bf16.msra.mxu0 %v513_v9 }
  0x15   :  { %456 = vmatprep.subr.bf16.mxu0 %v557_v2 }
  0x16   :  { %14 = vsyncpa [#allocation8], 0  ;;  %v515_v14 = vld [vmem:[%s734_s0 + $0x30] sm:$0xff]   ;;  %v29_v15 = vld [vmem:[%s740_s6] sm:$0xff]  ;;  %vm33_vm1 = vcmp.lt.s32.totalorder %v31_v10, 16  ;;  %473 = vmatpush3.bf16.msra.mxu1 %v520_v13  ;;  %s559_s12 = smov [#allocation7]  }
  0x17   :  { %v521_v16 = vld [vmem:[%s736_s2 + $0x20] sm:$0xff]   ;;  %474 = vmatprep.subr.bf16.mxu1 %v557_v2  ;;  %v516_v17 = vld [vmem:[%s734_s0 + $0x38] sm:$0xff]   ;;  %v34_v18 = vsel %vm33_vm1, %v29_v15, %v13_v0  ;;  %v522_v19 = vld [vmem:[%s736_s2 + $0x28] sm:$0xff]   ;;  %s384_s0 = sshll.u32 %s559_s12, 4  ;;  %s385_s0 = int_to_ptr.vmem [resolvable:$true] %s384_s0 }
  0x18   :  { %457 = vmatpush3.bf16.msra.mxu0 %v514_v12  ;;  %v90_v20 = vpack.c.bf16 %v34_v18, %v34_v18  ;;  %v523_v21 = vld [vmem:[%s736_s2 + $0x30] sm:$0xff]   ;;  %v524_v22 = vld [vmem:[%s736_s2 + $0x38] sm:$0xff]   ;;  %v525_v23 = vld [vmem:[%s738_s4] sm:$0xff]   ;;  %p538_p1 = scmp.lt.s32.totalorder %s385_s0, %s385_s0 }
  0x19   :  { %458 = vmatprep.subr.bf16.mxu0 %v557_v2  ;;  %v526_v24 = vld [vmem:[%s738_s4 + $0x8] sm:$0xff]   ;;  %v527_v25 = vld [vmem:[%s738_s4 + $0x10] sm:$0xff]   ;;  %v528_v26 = vld [vmem:[%s738_s4 + $0x18] sm:$0xff]  }
  0x1a   :  { %475 = vmatpush3.bf16.msra.mxu1 %v521_v16  ;;  %v529_v27 = vld [vmem:[%s738_s4 + $0x20] sm:$0xff]   ;;  %v530_v28 = vld [vmem:[%s738_s4 + $0x28] sm:$0xff]   ;;  %v531_v37 = vld [vmem:[%s738_s4 + $0x30] sm:$0xff]  }
  0x1b   :  { %476 = vmatprep.subr.bf16.mxu1 %v557_v2  ;;  %v392_v29 = vld [vmem:[%s735_s1] ss:$0 sm:$0xff]  ;;  %v532_v38 = vld [vmem:[%s738_s4 + $0x38] sm:$0xff]  }
  0x1c   :  { %459 = vmatpush3.bf16.msra.mxu0 %v515_v14  ;;  %v401_v39 = vld [vmem:[%s737_s3] ss:$0 sm:$0xff]  ;;  %s533_s3 = scalar_lea.vmem %s385_s0, 128 }
  0x1d   :  { %460 = vmatprep.subr.bf16.mxu0 %v557_v2  ;;  %v410_v47 = vld [vmem:[%s739_s5] ss:$0 sm:$0xff]  ;;  %p534_p0 = scmp.ne.s32.totalorder %s385_s0, %s533_s3  ;;  %p539_p2 = scmp.lt.s32.totalorder %s533_s3, %s533_s3 }
  0x1e   :  { %477 = vmatpush3.bf16.msra.mxu1 %v522_v19 }
  0x1f   :  { %478 = vmatprep.subr.bf16.mxu1 %v557_v2  ;;  %p540_p3 = por %p539_p2, %p538_p1 }
  0x20   :  { %461 = vmatpush3.bf16.msra.mxu0 %v516_v17 }
  0x21   :  { %486 = vmatprep.subr.bf16.mxu0 %v557_v2  ;;  %p541_p4 = pnand %p540_p3, %p534_p0 }
  0x22   :  { %479 = vmatpush3.bf16.msra.mxu1 %v523_v21 }
  0x23   :  { %463 = vmatmul.mubr.bf16.vlgmr.msra.gmra.mrb[0].mxu0 %v90_v20  ;;  %480 = vmatprep.subr.bf16.mxu1 %v557_v2 }
  0x24   :  { %502 = vmatprep.mubr.msk.bf16.mxu0 %vm558_vm0, %v557_v2  ;;  %487 = vmatpush3.bf16.msra.mxu0 %v525_v23 }
  0x25   :  { %488 = vmatprep.subr.bf16.mxu0 %v557_v2 }
  0x26   :  { %481 = vmatpush3.bf16.msra.mxu1 %v524_v22 }
  0x28   :  { %489 = vmatpush3.bf16.msra.mxu0 %v526_v24 }
  0x29   :  { %490 = vmatprep.subr.bf16.mxu0 %v557_v2 }
  0x2c   :  { %491 = vmatpush3.bf16.msra.mxu0 %v527_v25 }
  0x2d   :  { %492 = vmatprep.subr.bf16.mxu0 %v557_v2 }
  0x30   :  { %493 = vmatpush3.bf16.msra.mxu0 %v528_v26 }
  0x31   :  { %494 = vmatprep.subr.bf16.mxu0 %v557_v2 }
  0x34   :  { %495 = vmatpush3.bf16.msra.mxu0 %v529_v27 }
  0x35   :  { %496 = vmatprep.subr.bf16.mxu0 %v557_v2 }
  0x38   :  { %497 = vmatpush3.bf16.msra.mxu0 %v530_v28 }
  0x39   :  { %498 = vmatprep.subr.bf16.mxu0 %v557_v2 }
  0x3c   :  { %499 = vmatpush3.bf16.msra.mxu0 %v531_v37 }
  0x3d   :  { %500 = vmatprep.subr.bf16.mxu0 %v557_v2 }
  0x40   :  { %501 = vmatpush3.bf16.msra.mxu0 %v532_v38 }
  0xf6   :  { %v179_v30 = vpop.f32.mrb[0].mxu0 }
  0xf7   :  { %v180_v31 = vadd.f32 %v392_v29, %v179_v30  ;;  %v464_v32 = vpop.f32.mrb[1].mxu0 }
  0xf8   :  { %v182_v33 = vpop.f32.mrb[2].mxu0 }
  0xf9   :  { %v185_v34 = vmax.f32 %v180_v31, 0.0  ;;  %v465_v35 = vpop.f32.mrb[3].mxu0 }
  0xfb   :  { %v186_v36 = vpack.c.bf16 %v185_v34, %v185_v34 }
  0xfd   :  { %483 = vmatmul.mubr.bf16.vlgmr.msra.gmra.mrb[0].mxu1 %v186_v36 }
 0x1d0   :  { %v275_v40 = vpop.f32.mrb[0].mxu1 }
 0x1d1   :  { %v276_v41 = vadd.f32 %v401_v39, %v275_v40  ;;  %v484_v42 = vpop.f32.mrb[1].mxu1 }
 0x1d2   :  { %v278_v43 = vpop.f32.mrb[2].mxu1 }
 0x1d3   :  { %v281_v44 = vmax.f32 %v276_v41, 0.0  ;;  %v485_v45 = vpop.f32.mrb[3].mxu1 }
 0x1d5   :  { %v282_v46 = vpack.c.bf16 %v281_v44, %v281_v44 }
 0x1d7   :  { %503 = vmatmul.mubr.bf16.vlgmr.msra.gmra.mrb[4].mxu0 %v282_v46 }
 0x2aa   :  { %v371_v48 = vpop.f32.mrb[4].mxu0 }
 0x2ab   :  { %v372_v49 = vadd.f32 %v410_v47, %v371_v48  ;;  %v504_v50 = vpop.f32.mrb[5].mxu0 }
 0x2ac   :  { %v374_v51 = vpop.f32.mrb[6].mxu0 }
 0x2ad   :  { %377 = vst [vmem:[#allocation7] sm:$0xff] %v372_v49  ;;  %v505_v52 = vpop.f32.mrb[7].mxu0 }
 0x2ae   :  { %544 = shalt.err (!%p541_p4)
}
 0x2af   :  { %s545_s5 = scalar_lea.hbm %s742_s8, 128 }
 0x2b0   :  { %p546_p5 = scmp.ne.s32.totalorder %s742_s8, %s545_s5  ;;  %p549_p6 = scmp.lt.u32.totalorder %s545_s5, %s742_s8 }
 0x2b2   :  { %p551_p7 = pnand %p549_p6, %p546_p5 }
 0x2b4   :  { %554 = shalt.err (!%p551_p7)
}
 0x2b5   :  { %387 = dma.vmem_to_hbm [thread:$0]  %s385_s0, 128, %s742_s8, [#allocation8]  }
 0x2b6   :  { %555 = dma.done.wait [#allocation8], 128  }
 0x2b7   :  { %556 = vsyncadd [#allocation8], 4294967168 }
 0x2b8   :  { %391 = vsyncpa [#allocation8], 1 }

// kernel: _student_forward_impl.1
= control target key start
LH: loop header
LB: loop body
LE: loop exit
PB: predicated region body
PF: predicated region fallthrough
CT: control target
= control target key end

     0   :  { %v547_v1 = vmov 0.0   ;;  %vm548_vm0 = vmmov 0   ;;  %s716_s0 = inlined_call_operand.vmem [shape: f32[8,128], index: 0, kind: input, shape index: {}]   ;;  %s717_s1 = inlined_call_operand.vmem [shape: bf16[128,128], index: 1, kind: input, shape index: {}]   ;;  %s718_s2 = inlined_call_operand.vmem [shape: f32[1,128], index: 2, kind: input, shape index: {}]   ;;  %s719_s3 = inlined_call_operand.vmem [shape: bf16[128,128], index: 3, kind: input, shape index: {}]   ;;  %s720_s4 = inlined_call_operand.vmem [shape: f32[1,128], index: 4, kind: input, shape index: {}]   ;;  %s721_s5 = inlined_call_operand.vmem [shape: bf16[128,128], index: 5, kind: input, shape index: {}]   ;;  %s722_s6 = inlined_call_operand.vmem [shape: f32[1,128], index: 6, kind: input, shape index: {}]   ;;  %s723_s7 = inlined_call_operand.hbm [shape: f32[8,128], index: 7, kind: output, shape index: {}]  }
   0x1   :  { %v499_v0 = vld [vmem:[%s717_s1] sm:$0xff]   ;;  %436 = vmatprep.subr.bf16.mxu0 %v547_v1  ;;  %456 = vmatprep.subr.bf16.mxu1 %v547_v1  ;;  %v500_v2 = vld [vmem:[%s717_s1 + $0x8] sm:$0xff]   ;;  %v501_v3 = vld [vmem:[%s717_s1 + $0x10] sm:$0xff]  }
   0x2   :  { %437 = vmatpush3.bf16.msra.mxu0 %v499_v0  ;;  %452 = vmatprep.mubr.msk.bf16.mxu0 %vm548_vm0, %v547_v1  ;;  %v507_v4 = vld [vmem:[%s719_s3] sm:$0xff]   ;;  %v502_v5 = vld [vmem:[%s717_s1 + $0x18] sm:$0xff]   ;;  %v508_v6 = vld [vmem:[%s719_s3 + $0x8] sm:$0xff]  }
   0x3   :  { %438 = vmatprep.subr.bf16.mxu0 %v547_v1  ;;  %472 = vmatprep.mubr.msk.bf16.mxu1 %vm548_vm0, %v547_v1  ;;  %v503_v7 = vld [vmem:[%s717_s1 + $0x20] sm:$0xff]   ;;  %v509_v8 = vld [vmem:[%s719_s3 + $0x10] sm:$0xff]   ;;  %v504_v9 = vld [vmem:[%s717_s1 + $0x28] sm:$0xff]  }
   0x4   :  { %457 = vmatpush3.bf16.msra.mxu1 %v507_v4  ;;  %v510_v10 = vld [vmem:[%s719_s3 + $0x18] sm:$0xff]  }
   0x5   :  { %458 = vmatprep.subr.bf16.mxu1 %v547_v1 }
   0x6   :  { %439 = vmatpush3.bf16.msra.mxu0 %v500_v2 }
   0x7   :  { %440 = vmatprep.subr.bf16.mxu0 %v547_v1 }
   0x8   :  { %459 = vmatpush3.bf16.msra.mxu1 %v508_v6 }
   0x9   :  { %460 = vmatprep.subr.bf16.mxu1 %v547_v1 }
   0xa   :  { %441 = vmatpush3.bf16.msra.mxu0 %v501_v3 }
   0xb   :  { %442 = vmatprep.subr.bf16.mxu0 %v547_v1 }
   0xc   :  { %461 = vmatpush3.bf16.msra.mxu1 %v509_v8 }
   0xd   :  { %462 = vmatprep.subr.bf16.mxu1 %v547_v1 }
   0xe   :  { %443 = vmatpush3.bf16.msra.mxu0 %v502_v5 }
   0xf   :  { %444 = vmatprep.subr.bf16.mxu0 %v547_v1 }
  0x12   :  { %445 = vmatpush3.bf16.msra.mxu0 %v503_v7 }
  0x13   :  { %446 = vmatprep.subr.bf16.mxu0 %v547_v1 }
  0x14   :  { %12 = vsyncpa [#allocation3], 0  ;;  %v505_v11 = vld [vmem:[%s717_s1 + $0x30] sm:$0xff]   ;;  %463 = vmatpush3.bf16.msra.mxu1 %v510_v10  ;;  %v511_v12 = vld [vmem:[%s719_s3 + $0x20] sm:$0xff]   ;;  %s549_s30 = smov [#allocation2]  }
  0x15   :  { %464 = vmatprep.subr.bf16.mxu1 %v547_v1  ;;  %v506_v13 = vld [vmem:[%s717_s1 + $0x38] sm:$0xff]   ;;  %v79_v14 = vld [vmem:[%s716_s0] sm:$0xff]  ;;  %v512_v15 = vld [vmem:[%s719_s3 + $0x28] sm:$0xff]   ;;  %s374_s0 = sshll.u32 %s549_s30, 4  ;;  %s375_s0 = int_to_ptr.vmem [resolvable:$true] %s374_s0 }
  0x16   :  { %447 = vmatpush3.bf16.msra.mxu0 %v504_v9  ;;  %v80_v16 = vpack.c.bf16 %v79_v14, %v79_v14  ;;  %v513_v17 = vld [vmem:[%s719_s3 + $0x30] sm:$0xff]   ;;  %v514_v18 = vld [vmem:[%s719_s3 + $0x38] sm:$0xff]   ;;  %v515_v19 = vld [vmem:[%s721_s5] sm:$0xff]   ;;  %p528_p1 = scmp.lt.s32.totalorder %s375_s0, %s375_s0 }
  0x17   :  { %448 = vmatprep.subr.bf16.mxu0 %v547_v1  ;;  %v516_v20 = vld [vmem:[%s721_s5 + $0x8] sm:$0xff]   ;;  %v517_v21 = vld [vmem:[%s721_s5 + $0x10] sm:$0xff]   ;;  %v518_v22 = vld [vmem:[%s721_s5 + $0x18] sm:$0xff]  }
  0x18   :  { %465 = vmatpush3.bf16.msra.mxu1 %v511_v12  ;;  %v519_v23 = vld [vmem:[%s721_s5 + $0x20] sm:$0xff]   ;;  %v520_v24 = vld [vmem:[%s721_s5 + $0x28] sm:$0xff]   ;;  %v521_v33 = vld [vmem:[%s721_s5 + $0x30] sm:$0xff]  }
  0x19   :  { %466 = vmatprep.subr.bf16.mxu1 %v547_v1  ;;  %v382_v25 = vld [vmem:[%s718_s2] ss:$0 sm:$0xff]  ;;  %v522_v34 = vld [vmem:[%s721_s5 + $0x38] sm:$0xff]  }
  0x1a   :  { %449 = vmatpush3.bf16.msra.mxu0 %v505_v11  ;;  %v391_v35 = vld [vmem:[%s720_s4] ss:$0 sm:$0xff]  ;;  %s523_s4 = scalar_lea.vmem %s375_s0, 128 }
  0x1b   :  { %450 = vmatprep.subr.bf16.mxu0 %v547_v1  ;;  %v400_v43 = vld [vmem:[%s722_s6] ss:$0 sm:$0xff]  ;;  %p524_p0 = scmp.ne.s32.totalorder %s375_s0, %s523_s4  ;;  %p529_p2 = scmp.lt.s32.totalorder %s523_s4, %s523_s4 }
  0x1c   :  { %467 = vmatpush3.bf16.msra.mxu1 %v512_v15 }
  0x1d   :  { %468 = vmatprep.subr.bf16.mxu1 %v547_v1  ;;  %p530_p3 = por %p529_p2, %p528_p1 }
  0x1e   :  { %451 = vmatpush3.bf16.msra.mxu0 %v506_v13 }
  0x1f   :  { %476 = vmatprep.subr.bf16.mxu0 %v547_v1  ;;  %p531_p4 = pnand %p530_p3, %p524_p0 }
  0x20   :  { %469 = vmatpush3.bf16.msra.mxu1 %v513_v17 }
  0x21   :  { %453 = vmatmul.mubr.bf16.vlgmr.msra.gmra.mrb[0].mxu0 %v80_v16  ;;  %470 = vmatprep.subr.bf16.mxu1 %v547_v1 }
  0x22   :  { %492 = vmatprep.mubr.msk.bf16.mxu0 %vm548_vm0, %v547_v1  ;;  %477 = vmatpush3.bf16.msra.mxu0 %v515_v19 }
  0x23   :  { %478 = vmatprep.subr.bf16.mxu0 %v547_v1 }
  0x24   :  { %471 = vmatpush3.bf16.msra.mxu1 %v514_v18 }
  0x26   :  { %479 = vmatpush3.bf16.msra.mxu0 %v516_v20 }
  0x27   :  { %480 = vmatprep.subr.bf16.mxu0 %v547_v1 }
  0x2a   :  { %481 = vmatpush3.bf16.msra.mxu0 %v517_v21 }
  0x2b   :  { %482 = vmatprep.subr.bf16.mxu0 %v547_v1 }
  0x2e   :  { %483 = vmatpush3.bf16.msra.mxu0 %v518_v22 }
  0x2f   :  { %484 = vmatprep.subr.bf16.mxu0 %v547_v1 }
  0x32   :  { %485 = vmatpush3.bf16.msra.mxu0 %v519_v23 }
  0x33   :  { %486 = vmatprep.subr.bf16.mxu0 %v547_v1 }
  0x36   :  { %487 = vmatpush3.bf16.msra.mxu0 %v520_v24 }
  0x37   :  { %488 = vmatprep.subr.bf16.mxu0 %v547_v1 }
  0x3a   :  { %489 = vmatpush3.bf16.msra.mxu0 %v521_v33 }
  0x3b   :  { %490 = vmatprep.subr.bf16.mxu0 %v547_v1 }
  0x3e   :  { %491 = vmatpush3.bf16.msra.mxu0 %v522_v34 }
  0xf4   :  { %v169_v26 = vpop.f32.mrb[0].mxu0 }
  0xf5   :  { %v170_v27 = vadd.f32 %v382_v25, %v169_v26  ;;  %v454_v28 = vpop.f32.mrb[1].mxu0 }
  0xf6   :  { %v172_v29 = vpop.f32.mrb[2].mxu0 }
  0xf7   :  { %v175_v30 = vmax.f32 %v170_v27, 0.0  ;;  %v455_v31 = vpop.f32.mrb[3].mxu0 }
  0xf9   :  { %v176_v32 = vpack.c.bf16 %v175_v30, %v175_v30 }
  0xfb   :  { %473 = vmatmul.mubr.bf16.vlgmr.msra.gmra.mrb[0].mxu1 %v176_v32 }
 0x1ce   :  { %v265_v36 = vpop.f32.mrb[0].mxu1 }
 0x1cf   :  { %v266_v37 = vadd.f32 %v391_v35, %v265_v36  ;;  %v474_v38 = vpop.f32.mrb[1].mxu1 }
 0x1d0   :  { %v268_v39 = vpop.f32.mrb[2].mxu1 }
 0x1d1   :  { %v271_v40 = vmax.f32 %v266_v37, 0.0  ;;  %v475_v41 = vpop.f32.mrb[3].mxu1 }
 0x1d3   :  { %v272_v42 = vpack.c.bf16 %v271_v40, %v271_v40 }
 0x1d5   :  { %493 = vmatmul.mubr.bf16.vlgmr.msra.gmra.mrb[4].mxu0 %v272_v42 }
 0x2a8   :  { %v361_v44 = vpop.f32.mrb[4].mxu0 }
 0x2a9   :  { %v362_v45 = vadd.f32 %v400_v43, %v361_v44  ;;  %v494_v46 = vpop.f32.mrb[5].mxu0 }
 0x2aa   :  { %v364_v47 = vpop.f32.mrb[6].mxu0 }
 0x2ab   :  { %367 = vst [vmem:[#allocation2] sm:$0xff] %v362_v45  ;;  %v495_v48 = vpop.f32.mrb[7].mxu0 }
 0x2ac   :  { %534 = shalt.err (!%p531_p4)
}
 0x2ad   :  { %s535_s6 = scalar_lea.hbm %s723_s7, 128 }
 0x2ae   :  { %p536_p5 = scmp.ne.s32.totalorder %s723_s7, %s535_s6  ;;  %p539_p6 = scmp.lt.u32.totalorder %s535_s6, %s723_s7 }
 0x2b0   :  { %p541_p7 = pnand %p539_p6, %p536_p5 }
 0x2b2   :  { %544 = shalt.err (!%p541_p7)
}
 0x2b3   :  { %377 = dma.vmem_to_hbm [thread:$0]  %s375_s0, 128, %s723_s7, [#allocation3]  }
 0x2b4   :  { %545 = dma.done.wait [#allocation3], 128  }
 0x2b5   :  { %546 = vsyncadd [#allocation3], 4294967168 }
 0x2b6   :  { %381 = vsyncpa [#allocation3], 1 }

</bundles_post_ra>
